<compile_context>
chip_gen: v7x
topology: tpu7x:2x2x1
jax: 0.10.0
libtpu: 0.0.40
codegen_flags: <defaults>
</compile_context>

<pallas_src>
import jax
import jax.numpy as jnp
from jax.experimental import pallas as pl
from jax.experimental.pallas import tpu as pltpu

BN_EPS = 1e-5
PAD = 2
CIN, CMID, COUT = 3, 2, 3


def _fused_kernel(x_ref, w1_ref, b1_ref, w2_ref, b2_ref, out_ref):
    # x_ref:   (1, CIN, H, W)    VMEM  one NCHW image
    # w1_ref:  (CMID*CIN,)       SMEM  conv1 weight * BN scale, row-major (cout, cin)
    # b1_ref:  (CMID,)           SMEM  conv1 bias * BN scale
    # w2_ref:  (CMID*COUT,)      SMEM  conv-transpose weight, row-major (cin, cout)
    # b2_ref:  (COUT,)           SMEM  conv-transpose bias
    # out_ref: (1, COUT, Hp, Wp) VMEM  padded NCHW output image
    _, _, H, W = x_ref.shape
    _, _, Hp, Wp = out_ref.shape

    x = x_ref[0]                               # (CIN, H, W)
    xc = [x[k] for k in range(CIN)]            # per-channel (H, W) planes

    # Conv2d 1x1 (+ bias) with the BN scale pre-folded, then ReLU.
    # Pure VPU multiply-adds with scalar weights; the MXU stays idle.
    y1 = []
    for c in range(CMID):
        acc = xc[0] * w1_ref[c * CIN + 0]
        for k in range(1, CIN):
            acc = acc + xc[k] * w1_ref[c * CIN + k]
        y1.append(jnp.maximum(acc + b1_ref[c], 0.0))   # (H, W)

    # ZeroPad2d(2) + ConvTranspose2d 1x1 (+ bias):
    # assemble each padded output channel in registers (zero borders via
    # concatenation, then add bias so the border is exactly the bias), then
    # issue a single full-tile store.
    zcol = jnp.zeros((H, PAD), jnp.float32)
    zrow = jnp.zeros((PAD, Wp), jnp.float32)
    chans = []
    for o in range(COUT):
        acc = y1[0] * w2_ref[0 * COUT + o]
        for c in range(1, CMID):
            acc = acc + y1[c] * w2_ref[c * COUT + o]
        padded = jnp.concatenate(
            [zrow, jnp.concatenate([zcol, acc, zcol], axis=1), zrow], axis=0)
        chans.append((padded + b2_ref[o])[None])        # (1, Hp, Wp)

    out = jnp.concatenate(chans, axis=0)                # (COUT, Hp, Wp)
    out_ref[...] = out[None].astype(out_ref.dtype)      # one full-block store


def scale_eq_net_forward(x_nchw, w1, b1, gamma, w2, b2):
    """x_nchw: (N, 3, H, W) f32.  w1: (2,3,1,1), b1: (2,), gamma: (2,),
    w2: (2,3,1,1), b2: (3,).  Returns (N, 3, H+4, W+4)."""
    N, _, H, W = x_nchw.shape
    Hp, Wp = H + 2 * PAD, W + 2 * PAD

    # Fold eval-mode BatchNorm (mean=0, var=1, beta=0) into conv1 weight/bias.
    bn_scale = gamma / jnp.sqrt(1.0 + BN_EPS)                        # (CMID,)
    w1_f = (w1.reshape(CMID, CIN) * bn_scale[:, None]).reshape(-1)   # (6,)
    b1_f = (b1 * bn_scale).reshape(-1)                               # (2,)
    w2_f = w2.reshape(CMID * COUT)                                   # (6,)  (cin, cout)
    b2_f = b2.reshape(COUT)                                          # (3,)

    return pl.pallas_call(
        _fused_kernel,
        out_shape=jax.ShapeDtypeStruct((N, COUT, Hp, Wp), jnp.float32),
        grid_spec=pltpu.PrefetchScalarGridSpec(
            num_scalar_prefetch=0,
            grid=(N,),
            in_specs=[
                pl.BlockSpec((1, CIN, H, W), lambda n: (n, 0, 0, 0)),
                pl.BlockSpec(memory_space=pltpu.MemorySpace.SMEM),
                pl.BlockSpec(memory_space=pltpu.MemorySpace.SMEM),
                pl.BlockSpec(memory_space=pltpu.MemorySpace.SMEM),
                pl.BlockSpec(memory_space=pltpu.MemorySpace.SMEM),
            ],
            out_specs=pl.BlockSpec((1, COUT, Hp, Wp), lambda n: (n, 0, 0, 0)),
        ),
        compiler_params=pltpu.CompilerParams(
            dimension_semantics=("parallel",)),
    )(x_nchw, w1_f, b1_f, w2_f, b2_f)


def _reference(x_nchw, w1, b1, gamma, w2, b2):
    """Pure-JAX reference mirroring the PyTorch forward (eval-mode BN)."""
    y = jnp.einsum("nchw,oc->nohw", x_nchw, w1.reshape(CMID, CIN)) \
        + b1.reshape(1, CMID, 1, 1)
    y = y * (gamma / jnp.sqrt(1.0 + BN_EPS)).reshape(1, CMID, 1, 1)
    y = jnp.maximum(y, 0.0)
    y = jnp.pad(y, ((0, 0), (0, 0), (PAD, PAD), (PAD, PAD)))
    y = jnp.einsum("nchw,co->nohw", y, w2.reshape(CMID, COUT)) \
        + b2.reshape(1, COUT, 1, 1)
    return y


if __name__ == "__main__":
    key = jax.random.PRNGKey(0)
    k_x, k_w1, k_b1, k_g, k_w2, k_b2 = jax.random.split(key, 6)

    N, H, W = 2, 16, 16
    x = jax.random.normal(k_x, (N, CIN, H, W), dtype=jnp.float32)

    # Deterministic parameter init (PyTorch-style uniform bounds).
    k1 = 1.0 / jnp.sqrt(jnp.float32(CIN * 1 * 1))
    w1 = jax.random.uniform(k_w1, (CMID, CIN, 1, 1), jnp.float32, -k1, k1)
    b1 = jax.random.uniform(k_b1, (CMID,), jnp.float32, -k1, k1)

    # bn_weight_change: weight buffer = 10 * rand(2); bias/mean = 0, var = 1.
    gamma = 10.0 * jax.random.uniform(k_g, (CMID,), jnp.float32)

    k2 = 1.0 / jnp.sqrt(jnp.float32(COUT * 1 * 1))
    w2 = jax.random.uniform(k_w2, (CMID, COUT, 1, 1), jnp.float32, -k2, k2)
    b2 = jax.random.uniform(k_b2, (COUT,), jnp.float32, -k2, k2)

    out = scale_eq_net_forward(x, w1, b1, gamma, w2, b2)
    out = jax.block_until_ready(out)

    ref = _reference(x, w1, b1, gamma, w2, b2)
    assert out.shape == (N, COUT, H + 2 * PAD, W + 2 * PAD), out.shape
    assert jnp.allclose(out, ref, atol=1e-5, rtol=1e-5), "mismatch vs reference"

    print("KERNEL_OK")
</pallas_src>

<mosaic_0001>
module attributes {stable_mosaic.version = 11 : i64} {
  func.func @_fused_kernel(%arg0: i32, %arg1: memref<1x3x16x16xf32, #tpu.memory_space<vmem>>, %arg2: memref<6xf32, #tpu.memory_space<smem>>, %arg3: memref<2xf32, #tpu.memory_space<smem>>, %arg4: memref<6xf32, #tpu.memory_space<smem>>, %arg5: memref<3xf32, #tpu.memory_space<smem>>, %arg6: memref<1x3x20x20xf32, #tpu.memory_space<vmem>>) attributes {dimension_semantics = [#tpu.dimension_semantics<parallel>], iteration_bounds = array<i64: 2>, scalar_prefetch = 0 : i64, scratch_operands = 0 : i64, tpu.core_type = #tpu.core_type<tc>, window_params = [{transform_indices = @transform_0, window_bounds = array<i64: 1, 3, 16, 16>}, {transform_indices = @transform_1, window_bounds = array<i64: 6>}, {transform_indices = @transform_2, window_bounds = array<i64: 2>}, {transform_indices = @transform_3, window_bounds = array<i64: 6>}, {transform_indices = @transform_4, window_bounds = array<i64: 3>}, {transform_indices = @transform_5, window_bounds = array<i64: 1, 3, 20, 20>}]} {
    %c0 = arith.constant 0 : index
    %c0_0 = arith.constant 0 : index
    %c0_1 = arith.constant 0 : index
    %c0_2 = arith.constant 0 : index
    %0 = vector.load %arg1[%c0, %c0_0, %c0_1, %c0_2] : memref<1x3x16x16xf32, #tpu.memory_space<vmem>>, vector<1x3x16x16xf32>
    %1 = vector.shape_cast %0 : vector<1x3x16x16xf32> to vector<3x16x16xf32>
    %2 = vector.extract_strided_slice %1 {offsets = [0, 0, 0], sizes = [1, 16, 16], strides = [1, 1, 1]} : vector<3x16x16xf32> to vector<1x16x16xf32>
    %3 = vector.shape_cast %2 : vector<1x16x16xf32> to vector<16x16xf32>
    %4 = vector.extract_strided_slice %1 {offsets = [1, 0, 0], sizes = [1, 16, 16], strides = [1, 1, 1]} : vector<3x16x16xf32> to vector<1x16x16xf32>
    %5 = vector.shape_cast %4 : vector<1x16x16xf32> to vector<16x16xf32>
    %6 = vector.extract_strided_slice %1 {offsets = [2, 0, 0], sizes = [1, 16, 16], strides = [1, 1, 1]} : vector<3x16x16xf32> to vector<1x16x16xf32>
    %7 = vector.shape_cast %6 : vector<1x16x16xf32> to vector<16x16xf32>
    %c0_3 = arith.constant 0 : index
    %8 = memref.load %arg2[%c0_3] : memref<6xf32, #tpu.memory_space<smem>>
    %9 = vector.broadcast %8 : f32 to vector<16x16xf32>
    %10 = arith.mulf %3, %9 : vector<16x16xf32>
    %c1 = arith.constant 1 : index
    %11 = memref.load %arg2[%c1] : memref<6xf32, #tpu.memory_space<smem>>
    %12 = vector.broadcast %11 : f32 to vector<16x16xf32>
    %13 = arith.mulf %5, %12 : vector<16x16xf32>
    %14 = arith.addf %10, %13 : vector<16x16xf32>
    %c2 = arith.constant 2 : index
    %15 = memref.load %arg2[%c2] : memref<6xf32, #tpu.memory_space<smem>>
    %16 = vector.broadcast %15 : f32 to vector<16x16xf32>
    %17 = arith.mulf %7, %16 : vector<16x16xf32>
    %18 = arith.addf %14, %17 : vector<16x16xf32>
    %c0_4 = arith.constant 0 : index
    %19 = memref.load %arg3[%c0_4] : memref<2xf32, #tpu.memory_space<smem>>
    %20 = vector.broadcast %19 : f32 to vector<16x16xf32>
    %21 = arith.addf %18, %20 : vector<16x16xf32>
    %cst = arith.constant 0.000000e+00 : f32
    %22 = vector.broadcast %cst : f32 to vector<16x16xf32>
    %23 = arith.maximumf %21, %22 : vector<16x16xf32>
    %c3 = arith.constant 3 : index
    %24 = memref.load %arg2[%c3] : memref<6xf32, #tpu.memory_space<smem>>
    %25 = vector.broadcast %24 : f32 to vector<16x16xf32>
    %26 = arith.mulf %3, %25 : vector<16x16xf32>
    %c4 = arith.constant 4 : index
    %27 = memref.load %arg2[%c4] : memref<6xf32, #tpu.memory_space<smem>>
    %28 = vector.broadcast %27 : f32 to vector<16x16xf32>
    %29 = arith.mulf %5, %28 : vector<16x16xf32>
    %30 = arith.addf %26, %29 : vector<16x16xf32>
    %c5 = arith.constant 5 : index
    %31 = memref.load %arg2[%c5] : memref<6xf32, #tpu.memory_space<smem>>
    %32 = vector.broadcast %31 : f32 to vector<16x16xf32>
    %33 = arith.mulf %7, %32 : vector<16x16xf32>
    %34 = arith.addf %30, %33 : vector<16x16xf32>
    %c1_5 = arith.constant 1 : index
    %35 = memref.load %arg3[%c1_5] : memref<2xf32, #tpu.memory_space<smem>>
    %36 = vector.broadcast %35 : f32 to vector<16x16xf32>
    %37 = arith.addf %34, %36 : vector<16x16xf32>
    %cst_6 = arith.constant 0.000000e+00 : f32
    %38 = vector.broadcast %cst_6 : f32 to vector<16x16xf32>
    %39 = arith.maximumf %37, %38 : vector<16x16xf32>
    %cst_7 = arith.constant 0.000000e+00 : f32
    %40 = vector.broadcast %cst_7 : f32 to vector<16x2xf32>
    %cst_8 = arith.constant 0.000000e+00 : f32
    %41 = vector.broadcast %cst_8 : f32 to vector<2x20xf32>
    %c0_9 = arith.constant 0 : index
    %42 = memref.load %arg4[%c0_9] : memref<6xf32, #tpu.memory_space<smem>>
    %43 = vector.broadcast %42 : f32 to vector<16x16xf32>
    %44 = arith.mulf %23, %43 : vector<16x16xf32>
    %c3_10 = arith.constant 3 : index
    %45 = memref.load %arg4[%c3_10] : memref<6xf32, #tpu.memory_space<smem>>
    %46 = vector.broadcast %45 : f32 to vector<16x16xf32>
    %47 = arith.mulf %39, %46 : vector<16x16xf32>
    %48 = arith.addf %44, %47 : vector<16x16xf32>
    %49 = tpu.concatenate %40, %48, %40 in 1 : vector<16x2xf32>, vector<16x16xf32>, vector<16x2xf32> -> vector<16x20xf32>
    %50 = tpu.concatenate %41, %49, %41 in 0 : vector<2x20xf32>, vector<16x20xf32>, vector<2x20xf32> -> vector<20x20xf32>
    %c0_11 = arith.constant 0 : index
    %51 = memref.load %arg5[%c0_11] : memref<3xf32, #tpu.memory_space<smem>>
    %52 = vector.broadcast %51 : f32 to vector<20x20xf32>
    %53 = arith.addf %50, %52 : vector<20x20xf32>
    %54 = vector.shape_cast %53 : vector<20x20xf32> to vector<1x20x20xf32>
    %c1_12 = arith.constant 1 : index
    %55 = memref.load %arg4[%c1_12] : memref<6xf32, #tpu.memory_space<smem>>
    %56 = vector.broadcast %55 : f32 to vector<16x16xf32>
    %57 = arith.mulf %23, %56 : vector<16x16xf32>
    %c4_13 = arith.constant 4 : index
    %58 = memref.load %arg4[%c4_13] : memref<6xf32, #tpu.memory_space<smem>>
    %59 = vector.broadcast %58 : f32 to vector<16x16xf32>
    %60 = arith.mulf %39, %59 : vector<16x16xf32>
    %61 = arith.addf %57, %60 : vector<16x16xf32>
    %62 = tpu.concatenate %40, %61, %40 in 1 : vector<16x2xf32>, vector<16x16xf32>, vector<16x2xf32> -> vector<16x20xf32>
    %63 = tpu.concatenate %41, %62, %41 in 0 : vector<2x20xf32>, vector<16x20xf32>, vector<2x20xf32> -> vector<20x20xf32>
    %c1_14 = arith.constant 1 : index
    %64 = memref.load %arg5[%c1_14] : memref<3xf32, #tpu.memory_space<smem>>
    %65 = vector.broadcast %64 : f32 to vector<20x20xf32>
    %66 = arith.addf %63, %65 : vector<20x20xf32>
    %67 = vector.shape_cast %66 : vector<20x20xf32> to vector<1x20x20xf32>
    %c2_15 = arith.constant 2 : index
    %68 = memref.load %arg4[%c2_15] : memref<6xf32, #tpu.memory_space<smem>>
    %69 = vector.broadcast %68 : f32 to vector<16x16xf32>
    %70 = arith.mulf %23, %69 : vector<16x16xf32>
    %c5_16 = arith.constant 5 : index
    %71 = memref.load %arg4[%c5_16] : memref<6xf32, #tpu.memory_space<smem>>
    %72 = vector.broadcast %71 : f32 to vector<16x16xf32>
    %73 = arith.mulf %39, %72 : vector<16x16xf32>
    %74 = arith.addf %70, %73 : vector<16x16xf32>
    %75 = tpu.concatenate %40, %74, %40 in 1 : vector<16x2xf32>, vector<16x16xf32>, vector<16x2xf32> -> vector<16x20xf32>
    %76 = tpu.concatenate %41, %75, %41 in 0 : vector<2x20xf32>, vector<16x20xf32>, vector<2x20xf32> -> vector<20x20xf32>
    %c2_17 = arith.constant 2 : index
    %77 = memref.load %arg5[%c2_17] : memref<3xf32, #tpu.memory_space<smem>>
    %78 = vector.broadcast %77 : f32 to vector<20x20xf32>
    %79 = arith.addf %76, %78 : vector<20x20xf32>
    %80 = vector.shape_cast %79 : vector<20x20xf32> to vector<1x20x20xf32>
    %81 = tpu.concatenate %54, %67, %80 in 0 : vector<1x20x20xf32>, vector<1x20x20xf32>, vector<1x20x20xf32> -> vector<3x20x20xf32>
    %82 = vector.shape_cast %81 : vector<3x20x20xf32> to vector<1x3x20x20xf32>
    %c0_18 = arith.constant 0 : index
    %c0_19 = arith.constant 0 : index
    %c0_20 = arith.constant 0 : index
    %c0_21 = arith.constant 0 : index
    %83 = vector.load %arg6[%c0_18, %c0_19, %c0_20, %c0_21] : memref<1x3x20x20xf32, #tpu.memory_space<vmem>>, vector<1x3x20x20xf32>
    tpu.vector_store %arg6[%c0_18, %c0_19, %c0_20, %c0_21], %82 {strides = array<i32>} : memref<1x3x20x20xf32, #tpu.memory_space<vmem>>, vector<1x3x20x20xf32>,
    return
  }
  func.func @transform_0(%arg0: i32) -> (i32, i32, i32, i32) {
    %c0_i32 = arith.constant 0 : i32
    %c0_i32_0 = arith.constant 0 : i32
    %c0_i32_1 = arith.constant 0 : i32
    %c0_i32_2 = arith.constant 0 : i32
    return %arg0, %c0_i32, %c0_i32_0, %c0_i32_1 : i32, i32, i32, i32
  }
  func.func @transform_1(%arg0: i32) -> i32 {
    %c0_i32 = arith.constant 0 : i32
    %c0_i32_0 = arith.constant 0 : i32
    return %c0_i32 : i32
  }
  func.func @transform_2(%arg0: i32) -> i32 {
    %c0_i32 = arith.constant 0 : i32
    %c0_i32_0 = arith.constant 0 : i32
    return %c0_i32 : i32
  }
  func.func @transform_3(%arg0: i32) -> i32 {
    %c0_i32 = arith.constant 0 : i32
    %c0_i32_0 = arith.constant 0 : i32
    return %c0_i32 : i32
  }
  func.func @transform_4(%arg0: i32) -> i32 {
    %c0_i32 = arith.constant 0 : i32
    %c0_i32_0 = arith.constant 0 : i32
    return %c0_i32 : i32
  }
  func.func @transform_5(%arg0: i32) -> (i32, i32, i32, i32) {
    %c0_i32 = arith.constant 0 : i32
    %c0_i32_0 = arith.constant 0 : i32
    %c0_i32_1 = arith.constant 0 : i32
    %c0_i32_2 = arith.constant 0 : i32
    return %arg0, %c0_i32, %c0_i32_0, %c0_i32_1 : i32, i32, i32, i32
  }
}

</mosaic_0001>

<bundles_post_ra>
// kernel: tpu_custom_call.1
= control target key start
LH: loop header
LB: loop body
LE: loop exit
PB: predicated region body
PF: predicated region fallthrough
CT: control target
= control target key end

     0   :  { %10 = vsyncpa [#allocation3], 0  ;;  %s1119_s0 = inlined_call_operand.hbm [shape: f32[2,3,16,16], index: 0, kind: input, shape index: {}]   ;;  %s1120_s1 = inlined_call_operand.vmem [shape: f32[6], index: 1, kind: input, shape index: {}]   ;;  %s1121_s2 = inlined_call_operand.vmem [shape: f32[2], index: 2, kind: input, shape index: {}]   ;;  %s1122_s3 = inlined_call_operand.vmem [shape: f32[6], index: 3, kind: input, shape index: {}]   ;;  %s1123_s4 = inlined_call_operand.vmem [shape: f32[3], index: 4, kind: input, shape index: {}]   ;;  %s1124_s5 = inlined_call_operand.vmem [shape: f32[2,3,20,20], index: 5, kind: output, shape index: {}]  }
   0x1   :  { %12 = vsyncpa [#allocation3 + $0x1], 0 }
   0x2   :  { %13 = vsyncpa [#allocation4], 0 }
   0x3   :  { %14 = vsyncpa [#allocation7], 0 }
   0x4   :  { %15 = vsyncpa [#allocation10], 0  ;;  %s872_s18 = smov 0   ;;  %s874_s19 = smov 0  }
   0x5   :  { %s876_s20 = smov 0   ;;  %s878_s21 = smov 0  }
   0x6 LB: > { %s891_s22 = sadd.s32 4294967295, %s832_s21   ;;  %p41_p0 = scmp.ne.s32.totalorder %s824_s19, %s820_s18  ;;  %s832_s21 = sphi %s878_s21, %s1143_s21   ;;  %s828_s20 = sphi %s876_s20, %s1142_s20   ;;  %s824_s19 = sphi %s874_s19, %s1141_s19   ;;  %s820_s18 = sphi %s872_s18, %s1140_s18  }
   0x7   : > { %p1125_p1 = scmp.eq.s32.totalorder %s891_s22, 0  ;;  %p581_p2 = scmp.ge.s32.totalorder %s832_s21, 1 }
   0x8   : > { %p162_p3 = scmp.lt.s32.totalorder %s832_s21, 3  ;;  %s186_s26 = sshll.u32 %s1121_s2, 4  ;;  %s187_s26 = int_to_ptr.vmem [resolvable:$true] %s186_s26 }
   0x9   : > { %p899_p4 = por %p1125_p1, %p41_p0  ;;  %s175_s30 = sshll.u32 %s1120_s1, 4  ;;  %s176_s30 = int_to_ptr.vmem [resolvable:$true] %s175_s30 }
   0xa   : > { %p906_p5 = pnand %p581_p2, %p162_p3  ;;  %s197_s9 = sshll.u32 %s1122_s3, 4  ;;  %s924_s9 = int_to_ptr.vmem [resolvable:$true] %s197_s9 }
   0xb   : > { %s1128_s23 = scalar_select %p899_p4, 1, 0 }
   0xc   : > { %s1129_s27 = scalar_select %p906_p5, 1, 0 }
   0xd   : > { %p631_p6 = pneg %p906_p5  ;;  %s208_s12 = sshll.u32 %s1123_s4, 4  ;;  %s209_s12 = int_to_ptr.vmem [resolvable:$true] %s208_s12 }
   0xe   : > { %s696_s13 = scalar_lea.vmem %s187_s26, 16  ;;  %p704_p12 = scmp.lt.s32.totalorder %s187_s26, %s187_s26 }
   0xf   : > { %p917_p7 = pnand %p631_p6, %p1125_p1  ;;  %p697_p8 = scmp.ne.s32.totalorder %s187_s26, %s696_s13 }
  0x10   : > { %p705_p13 = scmp.lt.s32.totalorder %s696_s13, %s696_s13 }
  0x11   : > { %p698_p9 = pneg %p917_p7 }
  0x12   : > { %p706_p0 = por %p705_p13, %p704_p12 }
  0x13   : > { %p699_p10 = pnand %p698_p9, %p697_p8 }
  0x15   : > { %p700_p11 = pneg %p699_p10 }
  0x17   : > { %p707_p2 = pnand %p706_p0, %p700_p11 }
  0x19   : > { %710 = shalt.err (!%p707_p2)
}
  0x1a   : > { %s834_s14 = smov [#allocation6]   ;;  %s711_s15 = scalar_lea.vmem %s176_s30, 16 }
  0x1b   : > { %637 = dma.vmem_to_smem (!%p917_p7), %s187_s26, 16, %s834_s14, [#allocation7]  }
  0x1c   : > { %p712_p3 = scmp.ne.s32.totalorder %s176_s30, %s711_s15  ;;  %p719_p4 = scmp.lt.s32.totalorder %s176_s30, %s176_s30 }
  0x1d   : > { %p720_p5 = scmp.lt.s32.totalorder %s711_s15, %s711_s15 }
  0x1e   : > { %p714_p6 = pnand %p712_p3, %p698_p9 }
  0x1f   : > { %p721_p8 = por %p720_p5, %p719_p4 }
  0x20   : > { %p715_p1 = pneg %p714_p6 }
  0x22   : > { %p722_p10 = pnand %p721_p8, %p715_p1 }
  0x24   : > { %725 = shalt.err (!%p722_p10)
}
  0x25   : > { %s835_s16 = smov [#allocation5]   ;;  %s726_s17 = scalar_lea.vmem %s924_s9, 16 }
  0x26   : > { %634 = dma.vmem_to_smem (!%p917_p7), %s176_s30, 16, %s835_s16, [#allocation4]  }
  0x27   : > { %p727_p11 = scmp.ne.s32.totalorder %s924_s9, %s726_s17  ;;  %p734_p0 = scmp.lt.s32.totalorder %s924_s9, %s924_s9 }
  0x28   : > { %p735_p2 = scmp.lt.s32.totalorder %s726_s17, %s726_s17 }
  0x29   : > { %p729_p12 = pnand %p727_p11, %p698_p9 }
  0x2a   : > { %p736_p4 = por %p735_p2, %p734_p0 }
  0x2b   : > { %p730_p13 = pneg %p729_p12 }
  0x2d   : > { %p737_p1 = pnand %p736_p4, %p730_p13 }
  0x2f   : > { %740 = shalt.err (!%p737_p1)
}
  0x30   : > { %s836_s18 = smov [#allocation8]   ;;  %s741_s26 = scalar_lea.vmem %s209_s12, 16 }
  0x31   : > { %640 = dma.vmem_to_smem (!%p917_p7), %s924_s9, 16, %s836_s18, [#allocation7]  }
  0x32   : > { %p742_p5 = scmp.ne.s32.totalorder %s209_s12, %s741_s26  ;;  %p749_p8 = scmp.lt.s32.totalorder %s209_s12, %s209_s12 }
  0x33   : > { %p750_p10 = scmp.lt.s32.totalorder %s741_s26, %s741_s26 }
  0x34   : > { %p744_p3 = pnand %p742_p5, %p698_p9 }
  0x35   : > { %p751_p11 = por %p750_p10, %p749_p8 }
  0x36   : > { %p745_p6 = pneg %p744_p3 }
  0x38   : > { %p752_p12 = pnand %p751_p11, %p745_p6 }
  0x3a   : > { %755 = shalt.err (!%p752_p12)
}
  0x3b   : > { %s837_s28 = smov [#allocation9]   ;;  %s961_s29 = sadd.s32 1, %s832_s21  }
  0x3c   : > { %643 = dma.vmem_to_smem (!%p917_p7), %s209_s12, 16, %s837_s28, [#allocation10]  }
  0x3d   : > { %s25_s30 = ssub.s32 %s832_s21, %s961_s29  ;;  %s28_s7 = sadd.s32 1, %s828_s20 }
  0x3e   : > { %p26_p9 = scmp.eq.s32.totalorder %s25_s30, 0  ;;  %p35_p13 = scmp.ne.s32.totalorder %s828_s20, %s824_s19 }
  0x3f   : > { %p36_p0 = scmp.eq.s32.totalorder %s832_s21, 0  ;;  %p652_p4 = scmp.lt.s32.totalorder %s832_s21, 2 }
  0x40   : > { %s970_s6 = scalar_select %p26_p9, %s828_s20, %s28_s7  }
  0x41   : > { %p37_p2 = por %p36_p0, %p35_p13  ;;  %s219_s8 = sand.u32 1, %s828_s20  }
  0x42   : > { %s610_s9 = smul.u32 768, %s832_s21  ;;  %s986_s21 = scalar_lea.sflag [#allocation3], %s219_s8 }
  0x43   : > { %s609_s10 = smul.u32 48, %s219_s8  ;;  %p980_p7 = pnand %p652_p4, %p37_p2 }
  0x44   : > { %s978_s14 = scalar_lea.hbm %s1119_s0, %s610_s9  ;;  %s761_s25 = scalar_lea.hbm %s1119_s0, 1536 }
  0x45   : > { %s223_s15 = scalar_lea.vmem [#allocation2], %s609_s10  ;;  %s756_s17 = scalar_lea.hbm %s978_s14, 768 }
  0x46   : > { %s230_s16 = sshll.u32 %s223_s15, 4  ;;  %p757_p1 = scmp.ne.s32.totalorder %s978_s14, %s756_s17  ;;  %s984_s16 = int_to_ptr.vmem [resolvable:$true] %s230_s16 }
  0x47   : > { %p758_p5 = pneg %p980_p7  ;;  %p762_p8 = scmp.lt.u32.totalorder %s978_s14, %s1119_s0 }
  0x48   : > { %p763_p10 = scmp.lt.u32.totalorder %s761_s25, %s756_s17  ;;  %p765_p12 = scmp.lt.u32.totalorder %s756_s17, %s978_s14 }
  0x49   : > { %p759_p3 = pnand %p758_p5, %p757_p1 }
  0x4a   : > { %p764_p11 = por %p763_p10, %p762_p8 }
  0x4b   : > { %p760_p6 = pneg %p759_p3 }
  0x4c   : > { %p766_p9 = por %p765_p12, %p764_p11 }
  0x4e   : > { %p767_p13 = pnand %p766_p9, %p760_p6 }
  0x50   : > { %770 = shalt.err (!%p767_p13)
}
  0x51   : > { %s771_s30 = scalar_lea.vmem %s984_s16, 768  ;;  %s838_s7 = smov [#allocation2]  }
  0x52   : > { %p772_p0 = scmp.ne.s32.totalorder %s984_s16, %s771_s30  ;;  %s776_s8 = sshll.u32 %s838_s7, 4  ;;  %s777_s8 = int_to_ptr.vmem [resolvable:$false] %s776_s8 }
  0x53   : > { %s778_s9 = scalar_lea.vmem %s777_s8, 1536  ;;  %p779_p1 = scmp.lt.s32.totalorder %s984_s16, %s777_s8 }
  0x54   : > { %p774_p2 = pnand %p772_p0, %p758_p5  ;;  %p780_p3 = scmp.lt.s32.totalorder %s778_s9, %s771_s30 }
  0x56   : > { %p775_p4 = pneg %p774_p2  ;;  %p781_p8 = por %p780_p3, %p779_p1 }
  0x58   : > { %p782_p10 = pnand %p781_p8, %p775_p4 }
  0x5a   : > { %785 = shalt.err (!%p782_p10)
}
  0x5b   : > { %s839_s10 = smov 128   ;;  %s840_s11 = smov 8  }
  0x5c   : > { %647 = dma.hbm_to_vmem [thread:$0]  (!%p980_p7), %s978_s14, 768, %s984_s16, %s986_s21, %s839_s10, %s839_s10, %s840_s11  }
  0x5d   : > { %p1132_p5 = scmp.ne.s32.totalorder %s1129_s27, 0 }
  0x5e   : > { %s244_s13 = sand.u32 (!%p1132_p5), 1, %s824_s19   ;;  %p1133_p6 = scmp.ne.s32.totalorder (!%p1132_p5), %s1128_s23, 0 }
  0x5f   : > { %242 = sbr.rel (%p1132_p5) target bundleno = 273 (0x111), region = 40  ;;  %s245_s17 = scalar_lea.sflag (!%p1132_p5), [#allocation3], %s244_s13 }
  0x60   : > { %s611_s15 = smul.u32 (!%p1132_p5), 48, %s244_s13 }
  0x62   : > { %s248_s18 = scalar_lea.vmem (!%p1132_p5), [#allocation2], %s611_s15 }
  0x66   : > { %803 = dma.done.wait (%p1133_p6), %s245_s17, 768  }
  0x67   : > { %805 = vsyncadd (%p1133_p6), %s245_s17, 4294966528  ;;  %p1134_p11 = scmp.eq.s32.totalorder %s891_s22, 0 }
  0x69   : > { %807 = dma.done.wait (%p1134_p11), [#allocation4], 16   ;;  %p1135_p12 = pmov %p1134_p11 }
  0x6a   : > { %p1136_p7 = pmov %p1134_p11 }
  0x6b   : > { %809 = vsyncadd (%p1135_p12), [#allocation4], 4294967280 }
  0x6c   : > { %811 = dma.done.wait (%p1136_p7), [#allocation7], 32   ;;  %p1137_p9 = pmov %p1136_p7 }
  0x6d   : > { %p1138_p13 = pmov %p1136_p7 }
  0x6e   : > { %813 = vsyncadd (%p1137_p9), [#allocation7], 4294967264 }
  0x6f   : > { %815 = dma.done.wait (%p1138_p13), [#allocation10], 16   ;;  %p1139_p0 = pmov %p1136_p7 }
  0x71   : > { %817 = vsyncadd (%p1139_p0), [#allocation10], 4294967280 }
  0x72   : > { %269 = sfence }
  0x73   : > { %s303_s23 = sld [smem:[#allocation5]]  ;;  %s594_s27 = sld [smem:[#allocation5 + $0x1]]  ;;  %v297_v0 = vld [vmem:[%s248_s18] sm:$0xff]  ;;  %v298_v1 = vld [vmem:[%s248_s18 + $0x8] sm:$0xff]  ;;  %v299_v2 = vld [vmem:[%s248_s18 + $0x10] sm:$0xff]  ;;  %vm365_vm0 = vcmask 15360  }
  0x74   : > { %s595_s14 = sld [smem:[#allocation5 + $0x2]]  ;;  %s1033_s12 = sld [smem:[#allocation6]]  ;;  %v300_v3 = vld [vmem:[%s248_s18 + $0x18] sm:$0xff]  ;;  %v301_v4 = vld [vmem:[%s248_s18 + $0x20] sm:$0xff]  ;;  %v302_v5 = vld [vmem:[%s248_s18 + $0x28] sm:$0xff]  ;;  %vm368_vm1 = vcmask 146432  }
  0x75   : > { %s596_s16 = sld [smem:[#allocation5 + $0x3]]  ;;  %s597_s21 = sld [smem:[#allocation5 + $0x4]]  ;;  %vm373_vm2 = vcmask 1041408   ;;  %vm461_vm3 = vcmask 162816   ;;  %vm464_vm4 = vcmask 158720  }
  0x76   : > { %s1035_s24 = sld [smem:[#allocation5 + $0x5]]  ;;  %s1037_s25 = sld [smem:[#allocation6 + $0x1]] }
  0x77   : > { %s1039_s26 = sld [smem:[#allocation8 + $0x1]]  ;;  %s1041_s28 = sld [smem:[#allocation8]] }
  0x78   : > { %s1043_s30 = sld [smem:[#allocation8 + $0x4]]  ;;  %s1045_s7 = sld [smem:[#allocation8 + $0x3]] }
  0x79   : > { %v304_v6 = vstv %s303_s23  ;;  %v308_v9 = vstv %s594_s27  ;;  %s1049_s8 = sld [smem:[#allocation8 + $0x2]]  ;;  %s1051_s9 = sld [smem:[#allocation8 + $0x5]] }
  0x7a   : > { %v305_v7 = vmul.f32 %v304_v6, %v297_v0  ;;  %v306_v8 = vmul.f32 %v304_v6, %v298_v1  ;;  %v309_v10 = vmul.f32 %v308_v9, %v299_v2  ;;  %v310_v11 = vmul.f32 %v308_v9, %v300_v3  ;;  %s841_s10 = smov 2   ;;  %p292_p2 = scmp.lt.s32.totalorder %s891_s22, 1 }
  0x7b   : > { %v314_v12 = vstv %s595_s14  ;;  %v326_v15 = vstv %s596_s16  ;;  %v330_v16 = vstv %s597_s21  ;;  %v320_v21 = vstv %s1033_s12  ;;  %s603_s11 = sld [smem:[#allocation9 + $0x1]]  ;;  %s382_s13 = sld [smem:[#allocation9]] }
  0x7c   : > { %v315_v13 = vmul.f32 %v314_v12, %v301_v4  ;;  %v316_v14 = vmul.f32 %v314_v12, %v302_v5  ;;  %v311_v17 = vadd.f32 %v309_v10, %v305_v7  ;;  %v312_v18 = vadd.f32 %v310_v11, %v306_v8  ;;  %s1145_s22 = smov (!%p292_p2, %s891_s22), 1  ;;  %s606_s23 = sld [smem:[#allocation9 + $0x2]] }
  0x7d   : > { %v327_v19 = vmul.f32 %v326_v15, %v297_v0  ;;  %v328_v20 = vmul.f32 %v326_v15, %v298_v1  ;;  %v331_v22 = vmul.f32 %v330_v16, %v299_v2  ;;  %v332_v23 = vmul.f32 %v330_v16, %v300_v3  ;;  %s612_s15 = smul.u32 72, %s1145_s22 }
  0x7e   : > { %v336_v24 = vstv %s1035_s24  ;;  %v317_v25 = vadd.f32 %v315_v13, %v311_v17  ;;  %v318_v26 = vadd.f32 %v316_v14, %v312_v18  ;;  %v342_v33 = vstv %s1037_s25 }
  0x7f   : > { %v337_v27 = vmul.f32 %v336_v24, %v301_v4  ;;  %v338_v28 = vmul.f32 %v336_v24, %v302_v5  ;;  %v333_v29 = vadd.f32 %v331_v22, %v327_v19  ;;  %v334_v30 = vadd.f32 %v332_v23, %v328_v20  ;;  %s1069_s22 = scalar_lea.vmem %s1124_s5, %s612_s15 }
  0x80   : > { %v321_v31 = vadd.f32 %v320_v21, %v317_v25  ;;  %v322_v32 = vadd.f32 %v320_v21, %v318_v26  ;;  %v388_v38 = vstv %s1039_s26  ;;  %v348_v39 = vstv %s1041_s28 }
  0x81   : > { %v339_v34 = vadd.f32 %v337_v27, %v333_v29  ;;  %v340_v35 = vadd.f32 %v338_v28, %v334_v30  ;;  %v392_v42 = vstv %s1043_s30  ;;  %v352_v43 = vstv %s1045_s7 }
  0x82   : > { %v323_v36 = vmax.f32 %v321_v31, 0.0  ;;  %v324_v37 = vmax.f32 %v322_v32, 0.0  ;;  %v425_v50 = vstv %s1049_s8  ;;  %v429_v51 = vstv %s1051_s9 }
  0x83   : > { %v343_v40 = vadd.f32 %v342_v33, %v339_v34  ;;  %v344_v41 = vadd.f32 %v342_v33, %v340_v35  ;;  %v420_v8 = vstv %s603_s11  ;;  %v383_v10 = vstv %s382_s13 }
  0x84   : > { %v389_v46 = vmul.f32 %v388_v38, %v323_v36  ;;  %v349_v47 = vmul.f32 %v348_v39, %v323_v36  ;;  %v390_v48 = vmul.f32 %v388_v38, %v324_v37  ;;  %v350_v49 = vmul.f32 %v348_v39, %v324_v37 }
  0x85   : > { %v345_v44 = vmax.f32 %v343_v40, 0.0  ;;  %v346_v45 = vmax.f32 %v344_v41, 0.0  ;;  %v427_v58 = vmul.f32 %v425_v50, %v324_v37  ;;  %v426_v60 = vmul.f32 %v425_v50, %v323_v36 }
  0x86   : > { %v457_v38 = vstv %s606_s23 }
  0x87   : > { %v393_v52 = vmul.f32 %v392_v42, %v345_v44  ;;  %v394_v53 = vmul.f32 %v392_v42, %v346_v45  ;;  %v353_v54 = vmul.f32 %v352_v43, %v345_v44  ;;  %v354_v55 = vmul.f32 %v352_v43, %v346_v45 }
  0x88   : > { %v431_v59 = vmul.f32 %v429_v51, %v346_v45  ;;  %v430_v63 = vmul.f32 %v429_v51, %v345_v44 }
  0x89   : > { %v395_v56 = vadd.f32 %v393_v52, %v389_v46  ;;  %v355_v57 = vadd.f32 %v353_v54, %v349_v47  ;;  %v396_v61 = vadd.f32 %v394_v53, %v390_v48  ;;  %v356_v62 = vadd.f32 %v354_v55, %v350_v49 }
  0x8a   : > { %v433_v0 = vadd.f32 %v431_v59, %v427_v58  ;;  %v432_v1 = vadd.f32 %v430_v63, %v426_v60 }
  0x8b   : > { %399 = vrot.lane.b32.xlu1 %v395_v56, %s841_s10  ;;  %359 = vrot.lane.b32.xlu0 %v355_v57, %s841_s10 }
  0x8f   : > { %401 = vrot.lane.b32.xlu1 %v396_v61, %s841_s10  ;;  %361 = vrot.lane.b32.xlu0 %v356_v62, %s841_s10 }
  0x93   : > { %438 = vrot.lane.b32.xlu1 %v433_v0, %s841_s10  ;;  %436 = vrot.lane.b32.xlu0 %v432_v1, %s841_s10 }
  0xfd   : > { %v400_v2 = vpop.permute.xlu1 %399  ;;  %v360_v3 = vpop.permute.xlu0 %359 }
  0xfe   : > { %v405_v4 = vsel %vm365_vm0, 0.0, %v400_v2  ;;  %v366_v5 = vsel %vm365_vm0, 0.0, %v360_v3 }
  0xff   : > { %v407_v6 = vsel %vm368_vm1, %v405_v4, 0.0  ;;  %v369_v7 = vsel %vm368_vm1, %v366_v5, 0.0 }
 0x100   : > { %v411_v9 = vrot.slane %v407_v6, 6  ;;  %v374_v11 = vrot.slane %v369_v7, 6 }
 0x101   : > { %v402_v12 = vpop.permute.xlu1 %401  ;;  %v362_v13 = vpop.permute.xlu0 %361 }
 0x102   : > { %v417_v14 = vsel %vm373_vm2, 0.0, %v411_v9  ;;  %v380_v15 = vsel %vm373_vm2, 0.0, %v374_v11  ;;  %v406_v16 = vsel %vm365_vm0, 0.0, %v402_v12  ;;  %v367_v17 = vsel %vm365_vm0, 0.0, %v362_v13 }
 0x103   : > { %v421_v18 = vadd.f32 %v420_v8, %v417_v14  ;;  %v384_v19 = vadd.f32 %v383_v10, %v380_v15  ;;  %v408_v20 = vsel %vm368_vm1, %v406_v16, 0.0  ;;  %v370_v21 = vsel %vm368_vm1, %v367_v17, 0.0 }
 0x104   : > { %v412_v22 = vrot.slane %v408_v20, 6  ;;  %v375_v23 = vrot.slane %v370_v21, 6 }
 0x105   : > { %466 = vst.msk [vmem:[%s1069_s22 + $0x18] sm:$0xff] %vm461_vm3, %v421_v18  ;;  %462 = vst.msk [vmem:[%s1069_s22] sm:$0xff] %vm461_vm3, %v384_v19  ;;  %v439_v24 = vpop.permute.xlu1 %438  ;;  %v437_v25 = vpop.permute.xlu0 %436 }
 0x106   : > { %v413_v26 = vsel %vm373_vm2, %v411_v9, %v412_v22  ;;  %v418_v27 = vsel %vm373_vm2, %v412_v22, 0.0  ;;  %v376_v28 = vsel %vm373_vm2, %v374_v11, %v375_v23  ;;  %v381_v29 = vsel %vm373_vm2, %v375_v23, 0.0 }
 0x107   : > { %v422_v30 = vadd.f32 %v420_v8, %v413_v26  ;;  %v423_v31 = vadd.f32 %v420_v8, %v418_v27  ;;  %v385_v32 = vadd.f32 %v383_v10, %v376_v28  ;;  %v386_v33 = vadd.f32 %v383_v10, %v381_v29 }
 0x108   : > { %v443_v34 = vsel %vm365_vm0, 0.0, %v439_v24  ;;  %v442_v35 = vsel %vm365_vm0, 0.0, %v437_v25 }
 0x109   : > { %467 = vst.msk [vmem:[%s1069_s22 + $0x20] sm:$0xff] %vm461_vm3, %v422_v30  ;;  %463 = vst.msk [vmem:[%s1069_s22 + $0x8] sm:$0xff] %vm461_vm3, %v385_v32  ;;  %v445_v36 = vsel %vm368_vm1, %v443_v34, 0.0  ;;  %v444_v37 = vsel %vm368_vm1, %v442_v35, 0.0 }
 0x10a   : > { %468 = vst.msk [vmem:[%s1069_s22 + $0x28] sm:$0xf] %vm464_vm4, %v423_v31  ;;  %465 = vst.msk [vmem:[%s1069_s22 + $0x10] sm:$0xf] %vm464_vm4, %v386_v33  ;;  %v449_v39 = vrot.slane %v445_v36, 6  ;;  %v448_v40 = vrot.slane %v444_v37, 6 }
 0x10c   : > { %v455_v41 = vsel %vm373_vm2, %v449_v39, 0.0  ;;  %v450_v42 = vsel %vm373_vm2, %v448_v40, %v449_v39  ;;  %v454_v43 = vsel %vm373_vm2, 0.0, %v448_v40 }
 0x10d   : > { %v460_v44 = vadd.f32 %v457_v38, %v455_v41  ;;  %v458_v45 = vadd.f32 %v457_v38, %v454_v43  ;;  %v459_v46 = vadd.f32 %v457_v38, %v450_v42 }
 0x10f   : > { %471 = vst.msk [vmem:[%s1069_s22 + $0x40] sm:$0xf] %vm464_vm4, %v460_v44 }
 0x110   : > { %469 = vst.msk [vmem:[%s1069_s22 + $0x30] sm:$0xff] %vm461_vm3, %v458_v45  ;;  %470 = vst.msk [vmem:[%s1069_s22 + $0x38] sm:$0xff] %vm461_vm3, %v459_v46 }
 0x111 PF: > { %p18_p4 = scmp.ge.s32.totalorder %s961_s29, 4   ;;  %s1140_s18 = smov %s824_s19 }
 0x112   : > { %s1141_s19 = smov %s828_s20  ;;  %s1142_s20 = smov %s970_s6 }
 0x113   : > { %s1143_s21 = smov %s961_s29  ;;  %20 = sbr.rel (!%p18_p4) target bundleno = 6 (0x6), region = 97 }
 0x11a   :  { %493 = vsyncpa [#allocation3], 1 }
 0x11b   :  { %495 = vsyncpa [#allocation3 + $0x1], 1 }
 0x11c   :  { %496 = vsyncpa [#allocation4], 1 }
 0x11d   :  { %498 = vsyncpa [#allocation4 + $0x1], 1 }
 0x11e   :  { %499 = vsyncpa [#allocation7], 1 }
 0x11f   :  { %500 = vsyncpa [#allocation10], 1 }

</bundles_post_ra>
